<compile_context>
chip_gen: v5e
topology: v5e:2x2
jax: 0.10.0
libtpu: 0.0.40
codegen_flags: <defaults>
</compile_context>

<pallas_src>
import math
import numpy as np

import jax
import jax.numpy as jnp
from jax.experimental import pallas as pl
from jax.experimental.pallas import tpu as pltpu


# --------------------------------------------------------------------------- helpers
def _erf(x):
    # Abramowitz & Stegun 7.1.26 rational approximation (abs err ~1.5e-7).
    a1, a2, a3, a4, a5 = 0.254829592, -0.284496736, 1.421413741, -1.453152027, 1.061405429
    p = 0.3275911
    ax = jnp.abs(x)
    t = 1.0 / (1.0 + p * ax)
    poly = ((((a5 * t + a4) * t + a3) * t + a2) * t + a1) * t
    r = 1.0 - poly * jnp.exp(-ax * ax)
    return jnp.where(x >= 0, r, -r)


def _gelu(x):
    return 0.5 * x * (1.0 + _erf(x * (1.0 / math.sqrt(2.0))))


# --------------------------------------------------------------------------- kernel
def make_kernel(*, n_pool, R, C, Bp, L, P, scale,
                pool_offs, pool_lens, b_offs, b_lens):
    def kernel(x_ref, xr_ref, pstack_ref, *refs):
        coef_w = refs[:2 * n_pool]
        (wproj_ref, wemb_ref, wm1_ref, wm2_ref,
         mask_ref, bpack_ref, out_ref) = refs[2 * n_pool:]

        x = x_ref[0]            # (L, W)  batch folded into lanes, zero-padded to W lanes
        xr = xr_ref[0]          # (L, Bp*R)
        bpack = bpack_ref[...]  # (total_bias_rows, 1)

        def bias(i):
            off = b_offs[i]
            return bpack[off:off + b_lens[i]]          # (n_i, 1) broadcast over lanes

        # RevIN-style de-mean over the time axis (per channel/lane).
        seq_mean = jnp.mean(x, axis=0, keepdims=True)  # (1, W)
        xd = x - seq_mean

        # All avg-pool levels from ONE dot with the stacked block-mean matrix
        # (pooling pyramid no longer serializes MXU round trips).
        pooled_all = jnp.dot(pstack_ref[...], xd, preferred_element_type=jnp.float32)

        # Coefficient MLP chain (serial across layers by construction).
        feature = xd
        bi = 0
        for i in range(n_pool):
            po, ln = pool_offs[i], pool_lens[i]
            w1 = coef_w[2 * i][...]
            w2 = coef_w[2 * i + 1][...]
            h = jnp.dot(w1, feature, preferred_element_type=jnp.float32) + bias(bi); bi += 1
            h = _gelu(h)
            h = jnp.dot(w2, h, preferred_element_type=jnp.float32) + bias(bi); bi += 1
            feature = pooled_all[po:po + ln] + h       # (L/2^{i+1}, W)

        # Fused coefficient projection + single softmax over the combined 2R logits.
        logits = scale * (jnp.dot(wproj_ref[...], feature,
                                  preferred_element_type=jnp.float32) + bias(bi)); bi += 1
        m = jnp.max(logits, axis=0, keepdims=True)
        e = jnp.exp(logits - m)
        inv = pl.reciprocal(jnp.sum(e, axis=0, keepdims=True), approx=True)
        coeff = e * inv                                # (2R, W)
        x_coeff = coeff[:R]
        y_coeff = coeff[R:2 * R]

        # Fused reference embedding (Linear over time), split into past/future rows.
        refer = jnp.dot(wemb_ref[...], xr,
                        preferred_element_type=jnp.float32) + bias(bi); bi += 1   # (L+P, Bp*R)
        x_refp = refer[:L]
        y_refp = refer[L:L + P]

        # Per-sample bmm over all lanes at once via a block-diagonal coefficient matrix.
        if Bp > 1:
            x_tiled = jnp.concatenate([x_coeff] * Bp, axis=0)   # (Bp*R, W)
            y_tiled = jnp.concatenate([y_coeff] * Bp, axis=0)
        else:
            x_tiled, y_tiled = x_coeff, y_coeff
        bd = mask_ref[...]                                      # (Bp*R, W) block-diag 1/0 mask
        x_cycle = jnp.dot(x_refp, bd * x_tiled, preferred_element_type=jnp.float32)  # (L, W)
        y_cycle = jnp.dot(y_refp, bd * y_tiled, preferred_element_type=jnp.float32)  # (P, W)

        # Residual + prediction MLP: Linear(L->D) -> ReLU -> Linear(D->P).
        x2 = xd - x_cycle
        h = jnp.dot(wm1_ref[...], x2, preferred_element_type=jnp.float32) + bias(bi); bi += 1
        h = jnp.maximum(h, 0.0)
        y = jnp.dot(wm2_ref[...], h, preferred_element_type=jnp.float32) + bias(bi); bi += 1

        out_ref[0] = y + y_cycle + seq_mean            # (P, W) lane-dense (unmasked) store

    return kernel


# --------------------------------------------------------------------------- params
def init_params(key, L, P, C, R, D, n_pool):
    keys = iter(jax.random.split(key, 32))

    def lin_w(k, out_f, in_f):
        return jax.random.normal(k, (out_f, in_f), jnp.float32) * (1.0 / math.sqrt(in_f))

    def lin_b(k, out_f):
        return jax.random.normal(k, (out_f,), jnp.float32) * 0.01

    p = {}
    p["emb_w"] = lin_w(next(keys), L + P, L)
    p["emb_b"] = lin_b(next(keys), L + P)
    p["coef"] = []
    for i in range(n_pool):
        li, lo = L // 2 ** i, L // 2 ** (i + 1)
        p["coef"].append(dict(w1=lin_w(next(keys), lo, li), b1=lin_b(next(keys), lo),
                              w2=lin_w(next(keys), lo, lo), b2=lin_b(next(keys), lo)))
    p["proj_w"] = lin_w(next(keys), 2 * R, L // 2 ** n_pool)
    p["proj_b"] = lin_b(next(keys), 2 * R)
    p["m1_w"] = lin_w(next(keys), D, L)
    p["m1_b"] = lin_b(next(keys), D)
    p["m2_w"] = lin_w(next(keys), P, D)
    p["m2_b"] = lin_b(next(keys), P)
    p["dc"] = jnp.ones((L + P, C), jnp.float32)   # parameter exists but is dead in forward()
    return p


def build_kernel_operands(p, *, L, P, C, R, n_pool, Bp, lanes):
    # Stacked cumulative pooling matrices: level i is a block-mean over 2**(i+1) time steps.
    blocks = []
    for i in range(n_pool):
        w = 2 ** (i + 1)
        lo = L // w
        m = np.zeros((lo, L), np.float32)
        for j in range(lo):
            m[j, j * w:(j + 1) * w] = 1.0 / w
        blocks.append(m)
    pstack = jnp.asarray(np.concatenate(blocks, axis=0))
    pool_lens = [L // 2 ** (i + 1) for i in range(n_pool)]
    pool_offs = [int(v) for v in np.cumsum([0] + pool_lens[:-1])]

    coef_ws, bias_list = [], []
    for i in range(n_pool):
        c = p["coef"][i]
        coef_ws += [c["w1"], c["w2"]]
        bias_list += [c["b1"], c["b2"]]
    bias_list += [p["proj_b"], p["emb_b"], p["m1_b"], p["m2_b"]]

    # Pack every bias into a single (total, 1) operand with 8-row-aligned offsets.
    b_offs, b_lens, chunks, cur = [], [], [], 0
    for bvec in bias_list:
        bnp = np.asarray(bvec, np.float32)
        n = bnp.shape[0]
        b_offs.append(cur)
        b_lens.append(n)
        pad = (-n) % 8
        chunks.append(np.pad(bnp, (0, pad)))
        cur += n + pad
    bpack = jnp.asarray(np.concatenate(chunks))[:, None]

    # Block-diagonal mask used to express the per-sample bmm as one lane-wide dot.
    bd_mask = np.zeros((Bp * R, lanes), np.float32)
    for s in range(Bp):
        bd_mask[s * R:(s + 1) * R, s * C:(s + 1) * C] = 1.0
    bd_mask = jnp.asarray(bd_mask)

    operands = ([pstack] + coef_ws +
                [p["proj_w"], p["emb_w"], p["m1_w"], p["m2_w"], bd_mask, bpack])
    static = dict(pool_offs=pool_offs, pool_lens=pool_lens, b_offs=b_offs, b_lens=b_lens)
    return operands, static


def _cost_estimate(operands, x_c, xr_c, out_shape, *, L, P, C, R, D, n_pool, Bp, lanes, n_cores):
    W = lanes
    fl = 2 * sum(L // 2 ** (i + 1) for i in range(n_pool)) * L * W            # pooling stack
    for i in range(n_pool):
        li, lo = L // 2 ** i, L // 2 ** (i + 1)
        fl += 2 * lo * li * W + 2 * lo * lo * W                               # coef MLPs
    fl += 2 * (2 * R) * (L // 2 ** n_pool) * W                                # projection
    fl += 2 * (L + P) * L * (Bp * R)                                          # embedding
    fl += 2 * (L + P) * (Bp * R) * W                                          # block-diag bmm
    fl += 2 * D * L * W + 2 * P * D * W                                       # prediction MLP
    trans = W * (sum(L // 2 ** (i + 1) for i in range(n_pool)) + 2 * R + 1)   # exp + rcp
    byts = sum(int(np.prod(o.shape)) * 4 for o in operands)
    byts += int(np.prod(x_c.shape)) * 4 + int(np.prod(xr_c.shape)) * 4 + int(np.prod(out_shape)) * 4
    return pl.CostEstimate(flops=int(fl) * n_cores,
                           transcendentals=int(trans) * n_cores,
                           bytes_accessed=int(byts))


# --------------------------------------------------------------------------- wrapper
def model_forward(x, x_refer, x_dec, y_refer, params, *,
                  L, P, C, R, D, n_pool, n_cores=1):
    """Forward pass of MlpMFRS. Returns (y, y) like the torch module.

    n_cores=1 collapses the whole batch into a single kernel invocation (best on the
    single-TensorCore v5e/v6e); on v7x set n_cores=2 so the "parallel" grid axis shards the
    batch across both TensorCores.
    """
    del x_dec, y_refer          # unused by the reference forward()
    B = x.shape[0]
    assert B % n_cores == 0, "batch must split evenly across cores"
    Bp = B // n_cores
    lanes = max(128, ((Bp * C + 127) // 128) * 128)   # lane-dense, zero-padded width

    operands, static = build_kernel_operands(params, L=L, P=P, C=C, R=R,
                                             n_pool=n_pool, Bp=Bp, lanes=lanes)
    scale = 1.0 / math.sqrt(R)
    kernel = make_kernel(n_pool=n_pool, R=R, C=C, Bp=Bp, L=L, P=P, scale=scale, **static)

    # Fold the batch into the lane axis (time-major slabs), pad x-path lanes to `lanes`.
    x_c = jnp.transpose(x.reshape(n_cores, Bp, L, C), (0, 2, 1, 3)).reshape(n_cores, L, Bp * C)
    x_c = jnp.pad(x_c, ((0, 0), (0, 0), (0, lanes - Bp * C)))
    xr_c = jnp.transpose(x_refer.reshape(n_cores, Bp, L, R), (0, 2, 1, 3)).reshape(n_cores, L, Bp * R)

    in_specs = [pl.BlockSpec((1, L, lanes), lambda g: (g, 0, 0)),
                pl.BlockSpec((1, L, Bp * R), lambda g: (g, 0, 0))]
    in_specs += [pl.BlockSpec(w.shape, lambda g: (0, 0)) for w in operands]
    out_specs = pl.BlockSpec((1, P, lanes), lambda g: (g, 0, 0))

    cost = _cost_estimate(operands, x_c, xr_c, (n_cores, P, lanes),
                          L=L, P=P, C=C, R=R, D=D, n_pool=n_pool,
                          Bp=Bp, lanes=lanes, n_cores=n_cores)

    y3d = pl.pallas_call(
        kernel,
        out_shape=jax.ShapeDtypeStruct((n_cores, P, lanes), jnp.float32),
        grid=(n_cores,),
        in_specs=in_specs,
        out_specs=out_specs,
        compiler_params=pltpu.CompilerParams(dimension_semantics=("parallel",)),
        cost_estimate=cost,
    )(x_c, xr_c, *operands)

    # Un-fold: drop lane padding, restore (B, P, C).
    y = y3d[:, :, :Bp * C].reshape(n_cores, P, Bp, C)
    y = jnp.transpose(y, (0, 2, 1, 3)).reshape(B, P, C)
    return y, y


# --------------------------------------------------------------------------- plain-JAX reference
def reference_forward(x, x_refer, p, *, L, P, R, n_pool):
    HI = jax.lax.Precision.HIGHEST
    seq_mean = jnp.mean(x, axis=1, keepdims=True)
    xn = x - seq_mean
    xt = jnp.transpose(xn, (0, 2, 1))                       # (B, C, L)
    x_list = [xt]
    cur = xt
    for _ in range(n_pool):
        cur = 0.5 * (cur[:, :, 0::2] + cur[:, :, 1::2])
        x_list.append(cur)
    feature = x_list[0]
    for i in range(n_pool):
        c = p["coef"][i]
        h = jnp.matmul(feature, c["w1"].T, precision=HI) + c["b1"]
        h = _gelu(h)
        h = jnp.matmul(h, c["w2"].T, precision=HI) + c["b2"]
        feature = x_list[i + 1] + h
    scale = 1.0 / math.sqrt(R)
    coeff = jnp.matmul(feature, p["proj_w"].T, precision=HI) + p["proj_b"]
    coeff = jax.nn.softmax(scale * coeff, axis=2)
    coeff = jnp.transpose(coeff, (0, 2, 1))                 # (B, 2R, C)
    x_coeff, y_coeff = coeff[:, :R, :], coeff[:, R:, :]
    refer = jnp.matmul(jnp.transpose(x_refer, (0, 2, 1)), p["emb_w"].T, precision=HI) + p["emb_b"]
    refer = jnp.transpose(refer, (0, 2, 1))                 # (B, L+P, R)
    x_cycle = jnp.matmul(refer[:, :L, :], x_coeff, precision=HI)
    y_cycle = jnp.matmul(refer[:, L:, :], y_coeff, precision=HI)
    x2 = jnp.transpose(xn - x_cycle, (0, 2, 1))             # (B, C, L)
    h = jnp.maximum(jnp.matmul(x2, p["m1_w"].T, precision=HI) + p["m1_b"], 0.0)
    y = jnp.matmul(h, p["m2_w"].T, precision=HI) + p["m2_b"]
    y = jnp.transpose(y, (0, 2, 1))                         # (B, P, C)
    return y + y_cycle + seq_mean


# --------------------------------------------------------------------------- main
if __name__ == "__main__":
    B, L, P, C, R, D, N_POOL = 2, 16, 8, 4, 3, 32, 2   # batch, seq_len, pred_len, enc_in, ref_in, d_model, dn_layers

    key = jax.random.PRNGKey(0)
    k_x, k_xr, k_xd, k_yr, k_p = jax.random.split(key, 5)
    x = jax.random.normal(k_x, (B, L, C), jnp.float32)
    x_refer = jax.random.normal(k_xr, (B, L, R), jnp.float32)
    x_dec = jax.random.normal(k_xd, (B, P, C), jnp.float32)       # unused by forward()
    y_refer_in = jax.random.normal(k_yr, (B, P, R), jnp.float32)  # unused by forward()

    params = init_params(k_p, L, P, C, R, D, N_POOL)

    # n_cores=1: single fused invocation (best on v5e/v6e); use n_cores=2 on v7x.
    y_out, _ = model_forward(x, x_refer, x_dec, y_refer_in, params,
                             L=L, P=P, C=C, R=R, D=D, n_pool=N_POOL, n_cores=1)
    y_out = jax.block_until_ready(y_out)

    y_ref = jax.block_until_ready(
        reference_forward(x, x_refer, params, L=L, P=P, R=R, n_pool=N_POOL))
    # Slightly relaxed tolerance: pl.reciprocal(approx=True) in the softmax denominator.
    np.testing.assert_allclose(np.asarray(y_out), np.asarray(y_ref), rtol=1e-2, atol=1e-2)

    print("KERNEL_OK")
</pallas_src>

<mosaic_0001>
module attributes {stable_mosaic.version = 11 : i64} {
  func.func @kernel(%arg0: i32, %arg1: memref<1x16x128xf32, #tpu.memory_space<vmem>>, %arg2: memref<1x16x6xf32, #tpu.memory_space<vmem>>, %arg3: memref<12x16xf32, #tpu.memory_space<vmem>>, %arg4: memref<8x16xf32, #tpu.memory_space<vmem>>, %arg5: memref<8x8xf32, #tpu.memory_space<vmem>>, %arg6: memref<4x8xf32, #tpu.memory_space<vmem>>, %arg7: memref<4x4xf32, #tpu.memory_space<vmem>>, %arg8: memref<6x4xf32, #tpu.memory_space<vmem>>, %arg9: memref<24x16xf32, #tpu.memory_space<vmem>>, %arg10: memref<32x16xf32, #tpu.memory_space<vmem>>, %arg11: memref<8x32xf32, #tpu.memory_space<vmem>>, %arg12: memref<6x128xf32, #tpu.memory_space<vmem>>, %arg13: memref<104x1xf32, #tpu.memory_space<vmem>>, %arg14: memref<1x8x128xf32, #tpu.memory_space<vmem>>) attributes {dimension_semantics = [#tpu.dimension_semantics<parallel>], iteration_bounds = array<i64: 1>, scalar_prefetch = 0 : i64, scratch_operands = 0 : i64, tpu.core_type = #tpu.core_type<tc>, window_params = [{transform_indices = @transform_0, window_bounds = array<i64: 1, 16, 128>}, {transform_indices = @transform_1, window_bounds = array<i64: 1, 16, 6>}, {pipeline_mode = #tpu.pipeline_mode<synchronous>, transform_indices = @transform_2, window_bounds = array<i64: 12, 16>}, {pipeline_mode = #tpu.pipeline_mode<synchronous>, transform_indices = @transform_3, window_bounds = array<i64: 8, 16>}, {pipeline_mode = #tpu.pipeline_mode<synchronous>, transform_indices = @transform_4, window_bounds = array<i64: 8, 8>}, {pipeline_mode = #tpu.pipeline_mode<synchronous>, transform_indices = @transform_5, window_bounds = array<i64: 4, 8>}, {pipeline_mode = #tpu.pipeline_mode<synchronous>, transform_indices = @transform_6, window_bounds = array<i64: 4, 4>}, {pipeline_mode = #tpu.pipeline_mode<synchronous>, transform_indices = @transform_7, window_bounds = array<i64: 6, 4>}, {pipeline_mode = #tpu.pipeline_mode<synchronous>, transform_indices = @transform_8, window_bounds = array<i64: 24, 16>}, {pipeline_mode = #tpu.pipeline_mode<synchronous>, transform_indices = @transform_9, window_bounds = array<i64: 32, 16>}, {pipeline_mode = #tpu.pipeline_mode<synchronous>, transform_indices = @transform_10, window_bounds = array<i64: 8, 32>}, {pipeline_mode = #tpu.pipeline_mode<synchronous>, transform_indices = @transform_11, window_bounds = array<i64: 6, 128>}, {pipeline_mode = #tpu.pipeline_mode<synchronous>, transform_indices = @transform_12, window_bounds = array<i64: 104, 1>}, {transform_indices = @transform_13, window_bounds = array<i64: 1, 8, 128>}]} {
    %c0 = arith.constant 0 : index
    %c0_0 = arith.constant 0 : index
    %c0_1 = arith.constant 0 : index
    %0 = vector.load %arg1[%c0, %c0_0, %c0_1] : memref<1x16x128xf32, #tpu.memory_space<vmem>>, vector<1x16x128xf32>
    %1 = vector.shape_cast %0 : vector<1x16x128xf32> to vector<16x128xf32>
    %c0_2 = arith.constant 0 : index
    %c0_3 = arith.constant 0 : index
    %c0_4 = arith.constant 0 : index
    %2 = vector.load %arg2[%c0_2, %c0_3, %c0_4] : memref<1x16x6xf32, #tpu.memory_space<vmem>>, vector<1x16x6xf32>
    %3 = vector.shape_cast %2 : vector<1x16x6xf32> to vector<16x6xf32>
    %c0_5 = arith.constant 0 : index
    %c0_6 = arith.constant 0 : index
    %4 = vector.load %arg13[%c0_5, %c0_6] : memref<104x1xf32, #tpu.memory_space<vmem>>, vector<104x1xf32>
    %cst = arith.constant dense<0.000000e+00> : vector<128xf32>
    %5 = vector.multi_reduction <add>, %1, %cst [0] : vector<16x128xf32> to vector<128xf32>
    %6 = vector.shape_cast %5 : vector<128xf32> to vector<1x128xf32>
    %cst_7 = arith.constant 1.600000e+01 : f32
    %7 = vector.broadcast %cst_7 : f32 to vector<1x128xf32>
    %8 = arith.divf %6, %7 : vector<1x128xf32>
    %9 = vector.broadcast %8 : vector<1x128xf32> to vector<16x128xf32>
    %10 = arith.subf %1, %9 : vector<16x128xf32>
    %c0_8 = arith.constant 0 : index
    %c0_9 = arith.constant 0 : index
    %11 = vector.load %arg3[%c0_8, %c0_9] : memref<12x16xf32, #tpu.memory_space<vmem>>, vector<12x16xf32>
    %cst_10 = arith.constant dense<0.000000e+00> : vector<12x128xf32>
    %12 = tpu.matmul %11, %10, %cst_10 {dimension_numbers = #tpu.dot_dimension_numbers<[1], [0], [0], [1], [0, 0, 1, 1], [], []>} : vector<12x16xf32>, vector<16x128xf32>, vector<12x128xf32> -> vector<12x128xf32>
    %c0_11 = arith.constant 0 : index
    %c0_12 = arith.constant 0 : index
    %13 = vector.load %arg4[%c0_11, %c0_12] : memref<8x16xf32, #tpu.memory_space<vmem>>, vector<8x16xf32>
    %c0_13 = arith.constant 0 : index
    %c0_14 = arith.constant 0 : index
    %14 = vector.load %arg5[%c0_13, %c0_14] : memref<8x8xf32, #tpu.memory_space<vmem>>, vector<8x8xf32>
    %cst_15 = arith.constant dense<0.000000e+00> : vector<8x128xf32>
    %15 = tpu.matmul %13, %10, %cst_15 {dimension_numbers = #tpu.dot_dimension_numbers<[1], [0], [0], [1], [0, 0, 1, 1], [], []>} : vector<8x16xf32>, vector<16x128xf32>, vector<8x128xf32> -> vector<8x128xf32>
    %16 = vector.extract_strided_slice %4 {offsets = [0, 0], sizes = [8, 1], strides = [1, 1]} : vector<104x1xf32> to vector<8x1xf32>
    %17 = vector.broadcast %16 : vector<8x1xf32> to vector<8x128xf32>
    %18 = arith.addf %15, %17 : vector<8x128xf32>
    %cst_16 = arith.constant 5.000000e-01 : f32
    %19 = vector.broadcast %cst_16 : f32 to vector<8x128xf32>
    %20 = arith.mulf %19, %18 : vector<8x128xf32>
    %cst_17 = arith.constant 0.707106769 : f32
    %21 = vector.broadcast %cst_17 : f32 to vector<8x128xf32>
    %22 = arith.mulf %18, %21 : vector<8x128xf32>
    %23 = math.absf %22 : vector<8x128xf32>
    %cst_18 = arith.constant 0.327591091 : f32
    %24 = vector.broadcast %cst_18 : f32 to vector<8x128xf32>
    %25 = arith.mulf %24, %23 : vector<8x128xf32>
    %cst_19 = arith.constant 1.000000e+00 : f32
    %26 = vector.broadcast %cst_19 : f32 to vector<8x128xf32>
    %27 = arith.addf %26, %25 : vector<8x128xf32>
    %cst_20 = arith.constant 1.000000e+00 : f32
    %28 = vector.broadcast %cst_20 : f32 to vector<8x128xf32>
    %29 = arith.divf %28, %27 : vector<8x128xf32>
    %cst_21 = arith.constant 1.06140542 : f32
    %30 = vector.broadcast %cst_21 : f32 to vector<8x128xf32>
    %31 = arith.mulf %30, %29 : vector<8x128xf32>
    %cst_22 = arith.constant -1.45315206 : f32
    %32 = vector.broadcast %cst_22 : f32 to vector<8x128xf32>
    %33 = arith.addf %31, %32 : vector<8x128xf32>
    %34 = arith.mulf %33, %29 : vector<8x128xf32>
    %cst_23 = arith.constant 1.42141378 : f32
    %35 = vector.broadcast %cst_23 : f32 to vector<8x128xf32>
    %36 = arith.addf %34, %35 : vector<8x128xf32>
    %37 = arith.mulf %36, %29 : vector<8x128xf32>
    %cst_24 = arith.constant -0.284496725 : f32
    %38 = vector.broadcast %cst_24 : f32 to vector<8x128xf32>
    %39 = arith.addf %37, %38 : vector<8x128xf32>
    %40 = arith.mulf %39, %29 : vector<8x128xf32>
    %cst_25 = arith.constant 0.254829586 : f32
    %41 = vector.broadcast %cst_25 : f32 to vector<8x128xf32>
    %42 = arith.addf %40, %41 : vector<8x128xf32>
    %43 = arith.mulf %42, %29 : vector<8x128xf32>
    %cst_26 = arith.constant 0.000000e+00 : f32
    %44 = vector.broadcast %cst_26 : f32 to vector<8x128xf32>
    %45 = arith.subf %44, %23 : vector<8x128xf32>
    %46 = arith.mulf %45, %23 : vector<8x128xf32>
    %47 = math.exp %46 : vector<8x128xf32>
    %48 = arith.mulf %43, %47 : vector<8x128xf32>
    %cst_27 = arith.constant 1.000000e+00 : f32
    %49 = vector.broadcast %cst_27 : f32 to vector<8x128xf32>
    %50 = arith.subf %49, %48 : vector<8x128xf32>
    %cst_28 = arith.constant 0.000000e+00 : f32
    %51 = vector.broadcast %cst_28 : f32 to vector<8x128xf32>
    %52 = arith.cmpf oge, %22, %51 : vector<8x128xf32>
    %cst_29 = arith.constant 0.000000e+00 : f32
    %53 = vector.broadcast %cst_29 : f32 to vector<8x128xf32>
    %54 = arith.subf %53, %50 : vector<8x128xf32>
    %55 = arith.select %52, %50, %54 : vector<8x128xi1>, vector<8x128xf32>
    %cst_30 = arith.constant 1.000000e+00 : f32
    %56 = vector.broadcast %cst_30 : f32 to vector<8x128xf32>
    %57 = arith.addf %56, %55 : vector<8x128xf32>
    %58 = arith.mulf %20, %57 : vector<8x128xf32>
    %cst_31 = arith.constant dense<0.000000e+00> : vector<8x128xf32>
    %59 = tpu.matmul %14, %58, %cst_31 {dimension_numbers = #tpu.dot_dimension_numbers<[1], [0], [0], [1], [0, 0, 1, 1], [], []>} : vector<8x8xf32>, vector<8x128xf32>, vector<8x128xf32> -> vector<8x128xf32>
    %60 = vector.extract_strided_slice %4 {offsets = [8, 0], sizes = [8, 1], strides = [1, 1]} : vector<104x1xf32> to vector<8x1xf32>
    %61 = vector.broadcast %60 : vector<8x1xf32> to vector<8x128xf32>
    %62 = arith.addf %59, %61 : vector<8x128xf32>
    %63 = vector.extract_strided_slice %12 {offsets = [0, 0], sizes = [8, 128], strides = [1, 1]} : vector<12x128xf32> to vector<8x128xf32>
    %64 = arith.addf %63, %62 : vector<8x128xf32>
    %c0_32 = arith.constant 0 : index
    %c0_33 = arith.constant 0 : index
    %65 = vector.load %arg6[%c0_32, %c0_33] : memref<4x8xf32, #tpu.memory_space<vmem>>, vector<4x8xf32>
    %c0_34 = arith.constant 0 : index
    %c0_35 = arith.constant 0 : index
    %66 = vector.load %arg7[%c0_34, %c0_35] : memref<4x4xf32, #tpu.memory_space<vmem>>, vector<4x4xf32>
    %cst_36 = arith.constant dense<0.000000e+00> : vector<4x128xf32>
    %67 = tpu.matmul %65, %64, %cst_36 {dimension_numbers = #tpu.dot_dimension_numbers<[1], [0], [0], [1], [0, 0, 1, 1], [], []>} : vector<4x8xf32>, vector<8x128xf32>, vector<4x128xf32> -> vector<4x128xf32>
    %68 = vector.extract_strided_slice %4 {offsets = [16, 0], sizes = [4, 1], strides = [1, 1]} : vector<104x1xf32> to vector<4x1xf32>
    %69 = vector.broadcast %68 : vector<4x1xf32> to vector<4x128xf32>
    %70 = arith.addf %67, %69 : vector<4x128xf32>
    %cst_37 = arith.constant 5.000000e-01 : f32
    %71 = vector.broadcast %cst_37 : f32 to vector<4x128xf32>
    %72 = arith.mulf %71, %70 : vector<4x128xf32>
    %cst_38 = arith.constant 0.707106769 : f32
    %73 = vector.broadcast %cst_38 : f32 to vector<4x128xf32>
    %74 = arith.mulf %70, %73 : vector<4x128xf32>
    %75 = math.absf %74 : vector<4x128xf32>
    %cst_39 = arith.constant 0.327591091 : f32
    %76 = vector.broadcast %cst_39 : f32 to vector<4x128xf32>
    %77 = arith.mulf %76, %75 : vector<4x128xf32>
    %cst_40 = arith.constant 1.000000e+00 : f32
    %78 = vector.broadcast %cst_40 : f32 to vector<4x128xf32>
    %79 = arith.addf %78, %77 : vector<4x128xf32>
    %cst_41 = arith.constant 1.000000e+00 : f32
    %80 = vector.broadcast %cst_41 : f32 to vector<4x128xf32>
    %81 = arith.divf %80, %79 : vector<4x128xf32>
    %cst_42 = arith.constant 1.06140542 : f32
    %82 = vector.broadcast %cst_42 : f32 to vector<4x128xf32>
    %83 = arith.mulf %82, %81 : vector<4x128xf32>
    %cst_43 = arith.constant -1.45315206 : f32
    %84 = vector.broadcast %cst_43 : f32 to vector<4x128xf32>
    %85 = arith.addf %83, %84 : vector<4x128xf32>
    %86 = arith.mulf %85, %81 : vector<4x128xf32>
    %cst_44 = arith.constant 1.42141378 : f32
    %87 = vector.broadcast %cst_44 : f32 to vector<4x128xf32>
    %88 = arith.addf %86, %87 : vector<4x128xf32>
    %89 = arith.mulf %88, %81 : vector<4x128xf32>
    %cst_45 = arith.constant -0.284496725 : f32
    %90 = vector.broadcast %cst_45 : f32 to vector<4x128xf32>
    %91 = arith.addf %89, %90 : vector<4x128xf32>
    %92 = arith.mulf %91, %81 : vector<4x128xf32>
    %cst_46 = arith.constant 0.254829586 : f32
    %93 = vector.broadcast %cst_46 : f32 to vector<4x128xf32>
    %94 = arith.addf %92, %93 : vector<4x128xf32>
    %95 = arith.mulf %94, %81 : vector<4x128xf32>
    %cst_47 = arith.constant 0.000000e+00 : f32
    %96 = vector.broadcast %cst_47 : f32 to vector<4x128xf32>
    %97 = arith.subf %96, %75 : vector<4x128xf32>
    %98 = arith.mulf %97, %75 : vector<4x128xf32>
    %99 = math.exp %98 : vector<4x128xf32>
    %100 = arith.mulf %95, %99 : vector<4x128xf32>
    %cst_48 = arith.constant 1.000000e+00 : f32
    %101 = vector.broadcast %cst_48 : f32 to vector<4x128xf32>
    %102 = arith.subf %101, %100 : vector<4x128xf32>
    %cst_49 = arith.constant 0.000000e+00 : f32
    %103 = vector.broadcast %cst_49 : f32 to vector<4x128xf32>
    %104 = arith.cmpf oge, %74, %103 : vector<4x128xf32>
    %cst_50 = arith.constant 0.000000e+00 : f32
    %105 = vector.broadcast %cst_50 : f32 to vector<4x128xf32>
    %106 = arith.subf %105, %102 : vector<4x128xf32>
    %107 = arith.select %104, %102, %106 : vector<4x128xi1>, vector<4x128xf32>
    %cst_51 = arith.constant 1.000000e+00 : f32
    %108 = vector.broadcast %cst_51 : f32 to vector<4x128xf32>
    %109 = arith.addf %108, %107 : vector<4x128xf32>
    %110 = arith.mulf %72, %109 : vector<4x128xf32>
    %cst_52 = arith.constant dense<0.000000e+00> : vector<4x128xf32>
    %111 = tpu.matmul %66, %110, %cst_52 {dimension_numbers = #tpu.dot_dimension_numbers<[1], [0], [0], [1], [0, 0, 1, 1], [], []>} : vector<4x4xf32>, vector<4x128xf32>, vector<4x128xf32> -> vector<4x128xf32>
    %112 = vector.extract_strided_slice %4 {offsets = [24, 0], sizes = [4, 1], strides = [1, 1]} : vector<104x1xf32> to vector<4x1xf32>
    %113 = vector.broadcast %112 : vector<4x1xf32> to vector<4x128xf32>
    %114 = arith.addf %111, %113 : vector<4x128xf32>
    %115 = vector.extract_strided_slice %12 {offsets = [8, 0], sizes = [4, 128], strides = [1, 1]} : vector<12x128xf32> to vector<4x128xf32>
    %116 = arith.addf %115, %114 : vector<4x128xf32>
    %c0_53 = arith.constant 0 : index
    %c0_54 = arith.constant 0 : index
    %117 = vector.load %arg8[%c0_53, %c0_54] : memref<6x4xf32, #tpu.memory_space<vmem>>, vector<6x4xf32>
    %cst_55 = arith.constant dense<0.000000e+00> : vector<6x128xf32>
    %118 = tpu.matmul %117, %116, %cst_55 {dimension_numbers = #tpu.dot_dimension_numbers<[1], [0], [0], [1], [0, 0, 1, 1], [], []>} : vector<6x4xf32>, vector<4x128xf32>, vector<6x128xf32> -> vector<6x128xf32>
    %119 = vector.extract_strided_slice %4 {offsets = [32, 0], sizes = [6, 1], strides = [1, 1]} : vector<104x1xf32> to vector<6x1xf32>
    %120 = vector.broadcast %119 : vector<6x1xf32> to vector<6x128xf32>
    %121 = arith.addf %118, %120 : vector<6x128xf32>
    %cst_56 = arith.constant 0.577350259 : f32
    %122 = vector.broadcast %cst_56 : f32 to vector<6x128xf32>
    %123 = arith.mulf %122, %121 : vector<6x128xf32>
    %cst_57 = arith.constant dense<0xFF800000> : vector<128xf32>
    %124 = vector.multi_reduction <maximumf>, %123, %cst_57 [0] : vector<6x128xf32> to vector<128xf32>
    %125 = vector.shape_cast %124 : vector<128xf32> to vector<1x128xf32>
    %126 = vector.broadcast %125 : vector<1x128xf32> to vector<6x128xf32>
    %127 = arith.subf %123, %126 : vector<6x128xf32>
    %128 = math.exp %127 : vector<6x128xf32>
    %cst_58 = arith.constant dense<0.000000e+00> : vector<128xf32>
    %129 = vector.multi_reduction <add>, %128, %cst_58 [0] : vector<6x128xf32> to vector<128xf32>
    %130 = vector.shape_cast %129 : vector<128xf32> to vector<1x128xf32>
    %131 = tpu.reciprocal %130 {approx = true} : vector<1x128xf32> -> vector<1x128xf32>
    %132 = vector.broadcast %131 : vector<1x128xf32> to vector<6x128xf32>
    %133 = arith.mulf %128, %132 : vector<6x128xf32>
    %134 = vector.extract_strided_slice %133 {offsets = [0, 0], sizes = [3, 128], strides = [1, 1]} : vector<6x128xf32> to vector<3x128xf32>
    %135 = vector.extract_strided_slice %133 {offsets = [3, 0], sizes = [3, 128], strides = [1, 1]} : vector<6x128xf32> to vector<3x128xf32>
    %c0_59 = arith.constant 0 : index
    %c0_60 = arith.constant 0 : index
    %136 = vector.load %arg9[%c0_59, %c0_60] : memref<24x16xf32, #tpu.memory_space<vmem>>, vector<24x16xf32>
    %cst_61 = arith.constant dense<0.000000e+00> : vector<24x6xf32>
    %137 = tpu.matmul %136, %3, %cst_61 {dimension_numbers = #tpu.dot_dimension_numbers<[1], [0], [0], [1], [0, 0, 1, 1], [], []>} : vector<24x16xf32>, vector<16x6xf32>, vector<24x6xf32> -> vector<24x6xf32>
    %138 = vector.extract_strided_slice %4 {offsets = [40, 0], sizes = [24, 1], strides = [1, 1]} : vector<104x1xf32> to vector<24x1xf32>
    %139 = vector.broadcast %138 : vector<24x1xf32> to vector<24x6xf32>
    %140 = arith.addf %137, %139 : vector<24x6xf32>
    %141 = vector.extract_strided_slice %140 {offsets = [0, 0], sizes = [16, 6], strides = [1, 1]} : vector<24x6xf32> to vector<16x6xf32>
    %142 = vector.extract_strided_slice %140 {offsets = [16, 0], sizes = [8, 6], strides = [1, 1]} : vector<24x6xf32> to vector<8x6xf32>
    %143 = tpu.concatenate %134, %134 in 0 : vector<3x128xf32>, vector<3x128xf32> -> vector<6x128xf32>
    %144 = tpu.concatenate %135, %135 in 0 : vector<3x128xf32>, vector<3x128xf32> -> vector<6x128xf32>
    %c0_62 = arith.constant 0 : index
    %c0_63 = arith.constant 0 : index
    %145 = vector.load %arg12[%c0_62, %c0_63] : memref<6x128xf32, #tpu.memory_space<vmem>>, vector<6x128xf32>
    %146 = arith.mulf %145, %143 : vector<6x128xf32>
    %cst_64 = arith.constant dense<0.000000e+00> : vector<16x128xf32>
    %147 = tpu.matmul %141, %146, %cst_64 {dimension_numbers = #tpu.dot_dimension_numbers<[1], [0], [0], [1], [0, 0, 1, 1], [], []>} : vector<16x6xf32>, vector<6x128xf32>, vector<16x128xf32> -> vector<16x128xf32>
    %148 = arith.mulf %145, %144 : vector<6x128xf32>
    %cst_65 = arith.constant dense<0.000000e+00> : vector<8x128xf32>
    %149 = tpu.matmul %142, %148, %cst_65 {dimension_numbers = #tpu.dot_dimension_numbers<[1], [0], [0], [1], [0, 0, 1, 1], [], []>} : vector<8x6xf32>, vector<6x128xf32>, vector<8x128xf32> -> vector<8x128xf32>
    %150 = arith.subf %10, %147 : vector<16x128xf32>
    %c0_66 = arith.constant 0 : index
    %c0_67 = arith.constant 0 : index
    %151 = vector.load %arg10[%c0_66, %c0_67] : memref<32x16xf32, #tpu.memory_space<vmem>>, vector<32x16xf32>
    %cst_68 = arith.constant dense<0.000000e+00> : vector<32x128xf32>
    %152 = tpu.matmul %151, %150, %cst_68 {dimension_numbers = #tpu.dot_dimension_numbers<[1], [0], [0], [1], [0, 0, 1, 1], [], []>} : vector<32x16xf32>, vector<16x128xf32>, vector<32x128xf32> -> vector<32x128xf32>
    %153 = vector.extract_strided_slice %4 {offsets = [64, 0], sizes = [32, 1], strides = [1, 1]} : vector<104x1xf32> to vector<32x1xf32>
    %154 = vector.broadcast %153 : vector<32x1xf32> to vector<32x128xf32>
    %155 = arith.addf %152, %154 : vector<32x128xf32>
    %cst_69 = arith.constant 0.000000e+00 : f32
    %156 = vector.broadcast %cst_69 : f32 to vector<32x128xf32>
    %157 = arith.maximumf %155, %156 : vector<32x128xf32>
    %c0_70 = arith.constant 0 : index
    %c0_71 = arith.constant 0 : index
    %158 = vector.load %arg11[%c0_70, %c0_71] : memref<8x32xf32, #tpu.memory_space<vmem>>, vector<8x32xf32>
    %cst_72 = arith.constant dense<0.000000e+00> : vector<8x128xf32>
    %159 = tpu.matmul %158, %157, %cst_72 {dimension_numbers = #tpu.dot_dimension_numbers<[1], [0], [0], [1], [0, 0, 1, 1], [], []>} : vector<8x32xf32>, vector<32x128xf32>, vector<8x128xf32> -> vector<8x128xf32>
    %160 = vector.extract_strided_slice %4 {offsets = [96, 0], sizes = [8, 1], strides = [1, 1]} : vector<104x1xf32> to vector<8x1xf32>
    %161 = vector.broadcast %160 : vector<8x1xf32> to vector<8x128xf32>
    %162 = arith.addf %159, %161 : vector<8x128xf32>
    %163 = arith.addf %162, %149 : vector<8x128xf32>
    %164 = vector.broadcast %8 : vector<1x128xf32> to vector<8x128xf32>
    %165 = arith.addf %163, %164 : vector<8x128xf32>
    %c0_73 = arith.constant 0 : index
    %c0_74 = arith.constant 0 : index
    %c0_75 = arith.constant 0 : index
    %166 = vector.load %arg14[%c0_73, %c0_74, %c0_75] : memref<1x8x128xf32, #tpu.memory_space<vmem>>, vector<1x8x128xf32>
    %167 = vector.shape_cast %166 : vector<1x8x128xf32> to vector<8x128xf32>
    %168 = vector.shape_cast %165 : vector<8x128xf32> to vector<1x8x128xf32>
    tpu.vector_store %arg14[%c0_73, %c0_74, %c0_75], %168 {strides = array<i32>} : memref<1x8x128xf32, #tpu.memory_space<vmem>>, vector<1x8x128xf32>,
    return
  }
  func.func @transform_0(%arg0: i32) -> (i32, i32, i32) {
    %c0_i32 = arith.constant 0 : i32
    %c0_i32_0 = arith.constant 0 : i32
    %c0_i32_1 = arith.constant 0 : i32
    return %arg0, %c0_i32, %c0_i32_0 : i32, i32, i32
  }
  func.func @transform_1(%arg0: i32) -> (i32, i32, i32) {
    %c0_i32 = arith.constant 0 : i32
    %c0_i32_0 = arith.constant 0 : i32
    %c0_i32_1 = arith.constant 0 : i32
    return %arg0, %c0_i32, %c0_i32_0 : i32, i32, i32
  }
  func.func @transform_2(%arg0: i32) -> (i32, i32) {
    %c0_i32 = arith.constant 0 : i32
    %c0_i32_0 = arith.constant 0 : i32
    %c0_i32_1 = arith.constant 0 : i32
    return %c0_i32, %c0_i32_0 : i32, i32
  }
  func.func @transform_3(%arg0: i32) -> (i32, i32) {
    %c0_i32 = arith.constant 0 : i32
    %c0_i32_0 = arith.constant 0 : i32
    %c0_i32_1 = arith.constant 0 : i32
    return %c0_i32, %c0_i32_0 : i32, i32
  }
  func.func @transform_4(%arg0: i32) -> (i32, i32) {
    %c0_i32 = arith.constant 0 : i32
    %c0_i32_0 = arith.constant 0 : i32
    %c0_i32_1 = arith.constant 0 : i32
    return %c0_i32, %c0_i32_0 : i32, i32
  }
  func.func @transform_5(%arg0: i32) -> (i32, i32) {
    %c0_i32 = arith.constant 0 : i32
    %c0_i32_0 = arith.constant 0 : i32
    %c0_i32_1 = arith.constant 0 : i32
    return %c0_i32, %c0_i32_0 : i32, i32
  }
  func.func @transform_6(%arg0: i32) -> (i32, i32) {
    %c0_i32 = arith.constant 0 : i32
    %c0_i32_0 = arith.constant 0 : i32
    %c0_i32_1 = arith.constant 0 : i32
    return %c0_i32, %c0_i32_0 : i32, i32
  }
  func.func @transform_7(%arg0: i32) -> (i32, i32) {
    %c0_i32 = arith.constant 0 : i32
    %c0_i32_0 = arith.constant 0 : i32
    %c0_i32_1 = arith.constant 0 : i32
    return %c0_i32, %c0_i32_0 : i32, i32
  }
  func.func @transform_8(%arg0: i32) -> (i32, i32) {
    %c0_i32 = arith.constant 0 : i32
    %c0_i32_0 = arith.constant 0 : i32
    %c0_i32_1 = arith.constant 0 : i32
    return %c0_i32, %c0_i32_0 : i32, i32
  }
  func.func @transform_9(%arg0: i32) -> (i32, i32) {
    %c0_i32 = arith.constant 0 : i32
    %c0_i32_0 = arith.constant 0 : i32
    %c0_i32_1 = arith.constant 0 : i32
    return %c0_i32, %c0_i32_0 : i32, i32
  }
  func.func @transform_10(%arg0: i32) -> (i32, i32) {
    %c0_i32 = arith.constant 0 : i32
    %c0_i32_0 = arith.constant 0 : i32
    %c0_i32_1 = arith.constant 0 : i32
    return %c0_i32, %c0_i32_0 : i32, i32
  }
  func.func @transform_11(%arg0: i32) -> (i32, i32) {
    %c0_i32 = arith.constant 0 : i32
    %c0_i32_0 = arith.constant 0 : i32
    %c0_i32_1 = arith.constant 0 : i32
    return %c0_i32, %c0_i32_0 : i32, i32
  }
  func.func @transform_12(%arg0: i32) -> (i32, i32) {
    %c0_i32 = arith.constant 0 : i32
    %c0_i32_0 = arith.constant 0 : i32
    %c0_i32_1 = arith.constant 0 : i32
    return %c0_i32, %c0_i32_0 : i32, i32
  }
  func.func @transform_13(%arg0: i32) -> (i32, i32, i32) {
    %c0_i32 = arith.constant 0 : i32
    %c0_i32_0 = arith.constant 0 : i32
    %c0_i32_1 = arith.constant 0 : i32
    return %arg0, %c0_i32, %c0_i32_0 : i32, i32, i32
  }
}

</mosaic_0001>

<bundles_post_ra>
// kernel: tpu_custom_call.1
= control target key start
LH: loop header
LB: loop body
LE: loop exit
PB: predicated region body
PF: predicated region fallthrough
CT: control target
= control target key end

     0   :  { %v681_v1 = vmov 0   ;;  %v682_v4 = vmov 16.0   ;;  %s896_s0 = inlined_call_operand.vmem [shape: f32[1,16,128], index: 0, kind: input, shape index: {}]   ;;  %s897_s1 = inlined_call_operand.vmem [shape: f32[1,16,6], index: 1, kind: input, shape index: {}]   ;;  %s898_s2 = inlined_call_operand.vmem [shape: f32[12,16], index: 2, kind: input, shape index: {}]   ;;  %s899_s3 = inlined_call_operand.vmem [shape: f32[8,16], index: 3, kind: input, shape index: {}]   ;;  %s900_s4 = inlined_call_operand.vmem [shape: f32[8,8], index: 4, kind: input, shape index: {}]   ;;  %s901_s5 = inlined_call_operand.vmem [shape: f32[4,8], index: 5, kind: input, shape index: {}]   ;;  %s902_s6 = inlined_call_operand.vmem [shape: f32[4,4], index: 6, kind: input, shape index: {}]   ;;  %s903_s7 = inlined_call_operand.vmem [shape: f32[6,4], index: 7, kind: input, shape index: {}]   ;;  %s904_s8 = inlined_call_operand.vmem [shape: f32[24,16], index: 8, kind: input, shape index: {}]   ;;  %s905_s9 = inlined_call_operand.vmem [shape: f32[32,16], index: 9, kind: input, shape index: {}]   ;;  %s906_s10 = inlined_call_operand.vmem [shape: f32[8,32], index: 10, kind: input, shape index: {}]   ;;  %s907_s11 = inlined_call_operand.vmem [shape: f32[6,128], index: 11, kind: input, shape index: {}]   ;;  %s908_s12 = inlined_call_operand.vmem [shape: f32[104,1], index: 12, kind: input, shape index: {}]   ;;  %s909_s13 = inlined_call_operand.hbm [shape: f32[1,8,128], index: 13, kind: output, shape index: {}]  }
   0x1   :  { %v49_v0 = vld [vmem:[%s908_s12] sm:$0xff]  ;;  %638 = vset.pattern.permute.xlu0 %v681_v1  ;;  %v46_v3 = vld [vmem:[%s896_s0 + $0x8] sm:$0xff]  ;;  %641 = vrcp.f32 %v682_v4  ;;  %639 = vset.pattern.permute.xlu1 %v681_v1 }
   0x2   :  { %v45_v2 = vld [vmem:[%s896_s0] sm:$0xff]  ;;  %115 = vperm.xlu0 %638, %v49_v0   ;;  %640 = vset.pattern.permute.xlu2 %v681_v1 }
   0x3   :  { %v62_v5 = vadd.f32 %v46_v3, %v45_v2 }
   0x5   :  { %v63_v6 = vrot.slane %v62_v5, 4 }
   0x6   :  { %18 = vsyncpa [#allocation3], 0  ;;  %v50_v9 = vld [vmem:[%s908_s12 + $0x8] sm:$0xff]  ;;  %v55_v18 = vld [vmem:[%s908_s12 + $0x30] sm:$0xff]  ;;  %vm81_vm1 = vcmask 130048   ;;  %vm186_vm7 = vcmask 64512  }
   0x7   :  { %v64_v7 = vadd.f32 %v63_v6, %v62_v5  ;;  %v642_v8 = vpop.eup %641  ;;  %v111_v23 = vld [vmem:[%s899_s3] sm:$0xff]  ;;  %v48_v24 = vld [vmem:[%s897_s1 + $0x8] sm:$0xff]  ;;  %v59_v25 = vld [vmem:[%s908_s12 + $0x50] sm:$0xff]  ;;  %vm290_vm13 = vcmask 1043456   ;;  %vm286_vm14 = vcmask 31744   ;;  %vm348_vm15 = vcmask 1045504  }
   0x8   :  { %v70_v11 = vmul.f32 16.0, %v642_v8  ;;  %vm74_vm0 = vweird.f32 %v642_v8  ;;  %v47_v26 = vld [vmem:[%s897_s1] sm:$0xff]  ;;  %v369_v29 = vld [vmem:[%s904_s8 + $0x8] sm:$0xff]  ;;  %v51_v6 = vld [vmem:[%s908_s12 + $0x10] sm:$0xff]  ;;  %s683_s22 = smov [#allocation2]   ;;  %s602_s24 = sshll.u32 %s909_s13, 4  ;;  %s603_s24 = int_to_ptr.hbm [resolvable:$true] %s602_s24 }
   0x9   :  { %v65_v10 = vrot.slane %v64_v7, 2  ;;  %v368_v27 = vld [vmem:[%s904_s8] sm:$0xff]  ;;  %v80_v30 = vld [vmem:[%s898_s2 + $0x8] sm:$0xf]  ;;  %215 = vperm.xlu1 %639, %v51_v6   ;;  %s600_s23 = sshll.u32 %s683_s22, 4  ;;  %s601_s23 = int_to_ptr.vmem [resolvable:$true] %s600_s23 }
   0xa   :  { %183 = vperm.xlu0 %638, %v50_v9   ;;  %v71_v13 = vsub.f32 1.0, %v70_v11  ;;  %v61_v28 = vld [vmem:[%s908_s12 + $0x60] sm:$0xff]  ;;  %v58_v9 = vld [vmem:[%s908_s12 + $0x48] sm:$0xff] }
   0xb   :  { %v66_v12 = vadd.f32 %v65_v10, %v64_v7  ;;  %v79_v47 = vld [vmem:[%s898_s2] sm:$0xff]  ;;  %v52_v7 = vld [vmem:[%s908_s12 + $0x18] sm:$0xff] }
   0xc   :  { %v72_v15 = vmul.f32 %v642_v8, %v71_v13  ;;  %v112_v5 = vld [vmem:[%s900_s4] sm:$0xff] }
   0xd   :  { %v67_v14 = vrot.slane %v66_v12, 1 }
   0xe   :  { %v73_v17 = vadd.f32 %v642_v8, %v72_v15 }
   0xf   :  { %v68_v16 = vadd.f32 %v67_v14, %v66_v12 }
  0x10   :  { %v75_v19 = vsel %vm74_vm0, %v642_v8, %v73_v17  ;;  %v60_v8 = vld [vmem:[%s908_s12 + $0x58] sm:$0xff]  ;;  %vm424_vm0 = vcmask 1042432  }
  0x11   :  { %v769_v20 = vmul.f32 %v75_v19, %v68_v16  ;;  %283 = vperm.xlu1 %639, %v52_v7   ;;  %v211_v16 = vld [vmem:[%s901_s5] sm:$0xf] }
  0x12   :  { %378 = vperm.xlu0 %638, %v55_v18  }
  0x13   :  { %v772_v21 = vsub.f32 %v46_v3, %v769_v20  ;;  %v775_v22 = vsub.f32 %v45_v2, %v769_v20 }
  0x15   :  { %135 = vmatpush.msra.mxu1 %v772_v21  ;;  %633 = vmatpush.msra.mxu2 %v772_v21 }
  0x16   :  { %102 = vmatpush.msra.mxu0 %v772_v21 }
  0x17   :  { %136 = vmatpush.msra.mxu1 %v775_v22  ;;  %634 = vmatpush.msra.mxu2 %v775_v22 }
  0x18   :  { %613 = vmatmul.msk.f32.vlgmr.msra.gmra.mxu1 %vm81_vm1, %v111_v23  ;;  %103 = vmatpush.msra.mxu0 %v775_v22 }
  0x19   :  { %409 = vmatpush.msrb.mxu1 %v48_v24  ;;  %612 = vmatmul.msk.f32.vlgmr.msra.gmra.mxu2 %vm81_vm1, %v80_v30 }
  0x1a   :  { %509 = vperm.xlu0 %638, %v59_v25   ;;  %611 = vmatmul.msk.f32.vlgmr.msra.gmra.mxu0 %vm81_vm1, %v79_v47 }
  0x1b   :  { %410 = vmatpush.msrb.mxu1 %v47_v26  ;;  %514 = vperm.xlu1 %639, %v60_v8  }
  0x20   :  { %620 = vmatmul.msk.f32.vlgmr.msrb.gmra.mxu1 %vm81_vm1, %v368_v27 }
  0x22   :  { %565 = vperm.xlu0 %638, %v61_v28  }
  0x23   :  { %504 = vperm.xlu1 %639, %v58_v9  }
  0x28   :  { %621 = vmatmul.msk.f32.gmra.mxu1 %vm81_vm1, %v369_v29 }
  0x74   :  { %v116_v31 = vpop.permute.xlu0 %115 }
  0x7b   :  { %v216_v17 = vpop.permute.xlu1 %215 }
  0x7c   :  { %v184_v11 = vpop.permute.xlu0 %183 }
  0x95   :  { %v138_v32 = vpop.f32.mrf.mxu1 }
  0x96   :  { %v139_v33 = vadd.f32 %v138_v32, %v116_v31 }
  0x97   :  { %v105_v13 = vpop.f32.mrf.mxu0 }
  0x98   :  { %v142_v34 = vmul.f32 0.70710677, %v139_v33  ;;  %v141_v2 = vmul.f32 0.5, %v139_v33 }
  0x9a   :  { %v143_v35 = vand.u32 2147483647, %v142_v34  ;;  %vm176_vm6 = vcmp.ge.f32.partialorder %v142_v34, 0.0 }
  0x9c   :  { %v144_v36 = vmul.f32 0.3275911, %v143_v35  ;;  %v170_v48 = vsub.f32 0.0, %v143_v35  ;;  %v831_v10 = vpop.f32.mrf.mxu2 }
  0x9e   :  { %v145_v37 = vadd.f32 1.0, %v144_v36  ;;  %v171_v52 = vmul.f32 %v170_v48, %v143_v35 }
  0xa0   :  { %643 = vrcp.f32 %v145_v37  ;;  %v157_v41 = vand.u32 2147483648, %v145_v37  ;;  %v155_v43 = vand.u32 2147483647, %v145_v37  ;;  %vm151_vm3 = vweird.f32 %v145_v37 }
  0xa1   :  { %v172_v55 = vmul.f32 1.442695, %v171_v52 }
  0xa2   :  { %v158_v45 = vor.u32 1.1754944e-38, %v157_v41  ;;  %vm156_vm5 = vcmp.eq.f32.partialorder %v155_v43, 8.507059e+37 }
  0xa3   :  { %645 = vpow2.f32 %v172_v55 }
  0xa6   :  { %v644_v38 = vpop.eup %643 }
  0xa7   :  { %v147_v39 = vmul.f32 %v644_v38, %v145_v37  ;;  %vm152_vm2 = vweird.f32 %v644_v38 }
  0xa8   :  { %vm153_vm4 = vmor %vm151_vm3, %vm152_vm2  ;;  %vm431_vm2 = vcmask 48128  }
  0xa9   :  { %v148_v40 = vsub.f32 1.0, %v147_v39  ;;  %v646_v61 = vpop.eup %645 }
  0xab   :  { %v149_v42 = vmul.f32 %v644_v38, %v148_v40 }
  0xad   :  { %v150_v44 = vadd.f32 %v644_v38, %v149_v42 }
  0xaf   :  { %v154_v46 = vsel %vm153_vm4, %v644_v38, %v150_v44 }
  0xb0   :  { %v159_v49 = vsel %vm156_vm5, %v158_v45, %v154_v46 }
  0xb1   :  { %v161_v50 = vmul.f32 1.0614054, %v159_v49 }
  0xb3   :  { %v162_v51 = vadd.f32 -1.4531521, %v161_v50 }
  0xb5   :  { %v163_v53 = vmul.f32 %v162_v51, %v159_v49 }
  0xb7   :  { %v164_v54 = vadd.f32 1.4214138, %v163_v53 }
  0xb9   :  { %v165_v56 = vmul.f32 %v164_v54, %v159_v49 }
  0xbb   :  { %v166_v57 = vadd.f32 -0.28449672, %v165_v56 }
  0xbd   :  { %v167_v58 = vmul.f32 %v166_v57, %v159_v49  ;;  %v212_v57 = vld [vmem:[%s902_s6] sm:$0xf] }
  0xbf   :  { %v168_v59 = vadd.f32 0.2548296, %v167_v58  ;;  %v370_v58 = vld [vmem:[%s904_s8 + $0x10] sm:$0xff] }
  0xc0   :  { %622 = vmatmul.msk.f32.gmra.mxu1 %vm81_vm1, %v370_v58 }
  0xc1   :  { %v169_v60 = vmul.f32 %v168_v59, %v159_v49  ;;  %v53_v59 = vld [vmem:[%s908_s12 + $0x20] sm:$0xff] }
  0xc2   :  { %318 = vperm.xlu2 %640, %v53_v59  }
  0xc3   :  { %v174_v62 = vmul.f32 %v646_v61, %v169_v60  ;;  %v54_v60 = vld [vmem:[%s908_s12 + $0x28] sm:$0xff]  ;;  %v56_v61 = vld [vmem:[%s908_s12 + $0x38] sm:$0xff] }
  0xc5   :  { %v175_v63 = vsub.f32 1.0, %v174_v62  ;;  %v57_v62 = vld [vmem:[%s908_s12 + $0x40] sm:$0xff] }
  0xc7   :  { %v177_v0 = vsub.f32 0.0, %v175_v63 }
  0xc9   :  { %v178_v1 = vsel %vm176_vm6, %v175_v63, %v177_v0  ;;  %v284_v63 = vpop.permute.xlu1 %283 }
  0xca   :  { %v179_v3 = vadd.f32 1.0, %v178_v1  ;;  %373 = vperm.xlu2 %640, %v54_v60  }
  0xcc   :  { %v180_v4 = vmul.f32 %v179_v3, %v141_v2  ;;  %v315_v3 = vld [vmem:[%s903_s7] sm:$0x3f] }
  0xce   :  { %205 = vmatpush.msrb.mxu2 %v180_v4 }
  0xcf   :  { %614 = vmatmul.msk.f32.vlgmr.msrb.gmra.mxu2 %vm186_vm7, %v112_v5 }
  0xd2   :  { %383 = vperm.xlu2 %640, %v56_v61  }
  0xda   :  { %499 = vperm.xlu2 %640, %v57_v62  }
 0x11c   :  { %v319_v4 = vpop.permute.xlu2 %318 }
 0x152   :  { %v207_v12 = vpop.f32.mrf.mxu2 }
 0x153   :  { %v208_v14 = vadd.f32 %v207_v12, %v184_v11 }
 0x155   :  { %v210_v15 = vadd.f32 %v208_v14, %v105_v13 }
 0x157   :  { %236 = vmatpush.msra.mxu3 %v210_v15 }
 0x158   :  { %615 = vmatmul.msk.f32.vlgmr.msra.gmra.mxu3 %vm186_vm7, %v211_v16 }
 0x1db   :  { %v238_v18 = vpop.f32.mrf.mxu3 }
 0x1dc   :  { %v239_v19 = vadd.f32 %v238_v18, %v216_v17 }
 0x1de   :  { %v242_v23 = vmul.f32 0.70710677, %v239_v19  ;;  %v241_v54 = vmul.f32 0.5, %v239_v19 }
 0x1e0   :  { %v243_v24 = vand.u32 2147483647, %v242_v23  ;;  %vm276_vm12 = vcmp.ge.f32.partialorder %v242_v23, 0.0 }
 0x1e2   :  { %v244_v25 = vmul.f32 0.3275911, %v243_v24  ;;  %v270_v37 = vsub.f32 0.0, %v243_v24 }
 0x1e4   :  { %v245_v26 = vadd.f32 1.0, %v244_v25  ;;  %v271_v40 = vmul.f32 %v270_v37, %v243_v24  ;;  %v412_v24 = vpop.f32.mrf.mxu1 }
 0x1e6   :  { %647 = vrcp.f32 %v245_v26  ;;  %v257_v30 = vand.u32 2147483648, %v245_v26  ;;  %v255_v32 = vand.u32 2147483647, %v245_v26  ;;  %vm251_vm9 = vweird.f32 %v245_v26 }
 0x1e7   :  { %v272_v43 = vmul.f32 1.442695, %v271_v40 }
 0x1e8   :  { %v258_v34 = vor.u32 1.1754944e-38, %v257_v30  ;;  %vm256_vm11 = vcmp.eq.f32.partialorder %v255_v32, 8.507059e+37  ;;  %v374_v30 = vpop.permute.xlu2 %373 }
 0x1e9   :  { %649 = vpow2.f32 %v272_v43 }
 0x1ec   :  { %v648_v27 = vpop.eup %647 }
 0x1ed   :  { %v247_v28 = vmul.f32 %v648_v27, %v245_v26  ;;  %vm252_vm8 = vweird.f32 %v648_v27 }
 0x1ee   :  { %vm253_vm10 = vmor %vm251_vm9, %vm252_vm8 }
 0x1ef   :  { %v248_v29 = vsub.f32 1.0, %v247_v28  ;;  %v650_v49 = vpop.eup %649 }
 0x1f1   :  { %v249_v31 = vmul.f32 %v648_v27, %v248_v29  ;;  %v415_v29 = vpop.f32.mrf.mxu1 }
 0x1f3   :  { %v250_v33 = vadd.f32 %v648_v27, %v249_v31 }
 0x1f5   :  { %v254_v35 = vsel %vm253_vm10, %v648_v27, %v250_v33 }
 0x1f6   :  { %v259_v36 = vsel %vm256_vm11, %v258_v34, %v254_v35  ;;  %v429_v34 = vld [vmem:[%s907_s11] sm:$0x3f] }
 0x1f7   :  { %v261_v38 = vmul.f32 1.0614054, %v259_v36 }
 0x1f9   :  { %v262_v39 = vadd.f32 -1.4531521, %v261_v38 }
 0x1fb   :  { %v263_v41 = vmul.f32 %v262_v39, %v259_v36  ;;  %v384_v39 = vpop.permute.xlu2 %383 }
 0x1fd   :  { %v264_v42 = vadd.f32 1.4214138, %v263_v41 }
 0x1ff   :  { %v265_v44 = vmul.f32 %v264_v42, %v259_v36  ;;  %v413_v42 = vadd.f32 %v412_v24, %v374_v30 }
 0x201   :  { %v266_v45 = vadd.f32 -0.28449672, %v265_v44  ;;  %v379_v44 = vpop.permute.xlu0 %378 }
 0x203   :  { %v267_v46 = vmul.f32 %v266_v45, %v259_v36  ;;  %v416_v45 = vadd.f32 %v415_v29, %v379_v44 }
 0x205   :  { %v268_v47 = vadd.f32 0.2548296, %v267_v46 }
 0x207   :  { %v269_v48 = vmul.f32 %v268_v47, %v259_v36  ;;  %v418_v36 = vpop.f32.mrf.mxu1 }
 0x208   :  { %v419_v43 = vadd.f32 %v418_v36, %v384_v39 }
 0x209   :  { %v274_v50 = vmul.f32 %v650_v49, %v269_v48 }
 0x20b   :  { %v275_v51 = vsub.f32 1.0, %v274_v50  ;;  %v493_v50 = vld [vmem:[%s905_s9] sm:$0xff] }
 0x20d   :  { %v277_v52 = vsub.f32 0.0, %v275_v51 }
 0x20f   :  { %v278_v53 = vsel %vm276_vm12, %v275_v51, %v277_v52  ;;  %v494_v51 = vld [vmem:[%s905_s9 + $0x8] sm:$0xff] }
 0x210   :  { %v279_v55 = vadd.f32 1.0, %v278_v53 }
 0x212   :  { %v280_v56 = vmul.f32 %v279_v55, %v241_v54  ;;  %v515_v54 = vpop.permute.xlu1 %514 }
 0x214   :  { %616 = vmatpush.msk.msra.mxu2 %vm290_vm13, %v280_v56  ;;  %v510_v56 = vpop.permute.xlu0 %509 }
 0x215   :  { %617 = vmatmul.msk.f32.vlgmr.msra.gmra.mxu2 %vm286_vm14, %v212_v57 }
 0x21a   :  { %v505_v60 = vpop.permute.xlu1 %504 }
 0x298   :  { %v311_v0 = vpop.f32.mrf.mxu2 }
 0x299   :  { %v312_v1 = vadd.f32 %v311_v0, %v284_v63  ;;  %v500_v63 = vpop.permute.xlu2 %499 }
 0x29b   :  { %v314_v2 = vadd.f32 %v312_v1, %v831_v10 }
 0x29d   :  { %618 = vmatpush.msk.msrb.mxu3 %vm290_vm13, %v314_v2 }
 0x29e   :  { %619 = vmatmul.msk.f32.vlgmr.msrb.gmra.mxu3 %vm286_vm14, %v315_v3 }
 0x321   :  { %v344_v5 = vpop.f32.mrf.mxu3 }
 0x322   :  { %v345_v6 = vadd.f32 %v344_v5, %v319_v4  ;;  %v562_v4 = vld [vmem:[%s906_s10] sm:$0xff] }
 0x324   :  { %v347_v7 = vmul.f32 0.57735026, %v345_v6  ;;  %v566_v6 = vpop.permute.xlu0 %565 }
 0x326   :  { %v349_v8 = vsel %vm348_vm15, %v347_v7, -inf }
 0x327   :  { %v350_v9 = vrot.slane %v349_v8, 4 }
 0x329   :  { %v351_v11 = vmax.f32 %v349_v8, %v350_v9 }
 0x32b   :  { %v352_v12 = vrot.slane %v351_v11, 2 }
 0x32d   :  { %v353_v13 = vmax.f32 %v351_v11, %v352_v12 }
 0x32f   :  { %v354_v10 = vrot.slane %v353_v13, 1 }
 0x331   :  { %v355_v14 = vmax.f32 %v353_v13, %v354_v10 }
 0x333   :  { %v356_v15 = vsub.f32 %v347_v7, %v355_v14 }
 0x335   :  { %v357_v16 = vmul.f32 1.442695, %v356_v15 }
 0x337   :  { %651 = vpow2.f32 %v357_v16 }
 0x33d   :  { %v652_v17 = vpop.eup %651 }
 0x33e   :  { %v359_v18 = vsel %vm348_vm15, %v652_v17, 0.0 }
 0x33f   :  { %v360_v19 = vrot.slane %v359_v18, 4 }
 0x341   :  { %v361_v23 = vadd.f32 %v360_v19, %v359_v18 }
 0x343   :  { %v362_v25 = vrot.slane %v361_v23, 2 }
 0x345   :  { %v363_v26 = vadd.f32 %v362_v25, %v361_v23 }
 0x347   :  { %v364_v27 = vrot.slane %v363_v26, 1 }
 0x349   :  { %v365_v28 = vadd.f32 %v364_v27, %v363_v26 }
 0x34b   :  { %653 = vrcp.f32 %v365_v28 }
 0x351   :  { %v654_v31 = vpop.eup %653 }
 0x352   :  { %v367_v32 = vmul.f32 %v654_v31, %v652_v17 }
 0x354   :  { %v422_v33 = vrot.slane %v367_v32, 5  ;;  %v426_v35 = vrot.slane %v367_v32, 3 }
 0x356   :  { %v425_v37 = vsel %vm424_vm0, %v367_v32, %v422_v33  ;;  %v428_v38 = vsel %vm424_vm0, %v426_v35, %v367_v32 }
 0x357   :  { %v430_v40 = vmul.f32 %v429_v34, %v425_v37  ;;  %v464_v41 = vmul.f32 %v429_v34, %v428_v38 }
 0x359   :  { %623 = vmatpush.msk.msrb.mxu2 %vm348_vm15, %v430_v40  ;;  %626 = vmatpush.msk.msra.mxu3 %vm348_vm15, %v464_v41 }
 0x35a   :  { %624 = vmatmul.msk.f32.vlgmr.msrb.gmra.mxu2 %vm431_vm2, %v413_v42  ;;  %627 = vmatmul.msk.f32.vlgmr.msra.gmra.mxu3 %vm431_vm2, %v419_v43 }
 0x362   :  { %625 = vmatmul.msk.f32.gmra.mxu2 %vm431_vm2, %v416_v45 }
 0x3dd   :  { %v458_v46 = vpop.f32.mrf.mxu2  ;;  %v488_v5 = vpop.f32.mrf.mxu3 }
 0x3de   :  { %v491_v49 = vsub.f32 %v775_v22, %v458_v46  ;;  %v496_v22 = vld [vmem:[%s905_s9 + $0x18] sm:$0xff] }
 0x3e5   :  { %v461_v47 = vpop.f32.mrf.mxu2 }
 0x3e6   :  { %v492_v48 = vsub.f32 %v772_v21, %v461_v47  ;;  %v495_v21 = vld [vmem:[%s905_s9 + $0x10] sm:$0xff] }
 0x3e8   :  { %543 = vmatpush.msrb.mxu0 %v492_v48 }
 0x3ea   :  { %544 = vmatpush.msrb.mxu0 %v491_v49 }
 0x3eb   :  { %628 = vmatmul.msk.f32.vlgmr.msrb.gmra.mxu0 %vm81_vm1, %v493_v50 }
 0x3f3   :  { %629 = vmatmul.msk.f32.gmra.mxu0 %vm81_vm1, %v494_v51 }
 0x3fb   :  { %630 = vmatmul.msk.f32.gmra.mxu0 %vm81_vm1, %v495_v21 }
 0x403   :  { %631 = vmatmul.msk.f32.gmra.mxu0 %vm81_vm1, %v496_v22  ;;  %vm568_vm1 = vcmask 261120  }
 0x468   :  { %v546_v52 = vpop.f32.mrf.mxu0 }
 0x469   :  { %v547_v0 = vadd.f32 %v546_v52, %v500_v63 }
 0x46b   :  { %v558_v3 = vmax.f32 %v547_v0, 0.0 }
 0x470   :  { %v549_v53 = vpop.f32.mrf.mxu0 }
 0x471   :  { %v550_v61 = vadd.f32 %v549_v53, %v505_v60 }
 0x473   :  { %v559_v2 = vmax.f32 %v550_v61, 0.0 }
 0x478   :  { %v552_v55 = vpop.f32.mrf.mxu0 }
 0x479   :  { %v553_v58 = vadd.f32 %v552_v55, %v510_v56 }
 0x47b   :  { %v560_v1 = vmax.f32 %v553_v58, 0.0 }
 0x480   :  { %v555_v57 = vpop.f32.mrf.mxu0 }
 0x481   :  { %v556_v59 = vadd.f32 %v555_v57, %v515_v54 }
 0x483   :  { %v561_v62 = vmax.f32 %v556_v59, 0.0 }
 0x485   :  { %584 = vmatpush.msrb.mxu3 %v561_v62 }
 0x487   :  { %585 = vmatpush.msrb.mxu3 %v560_v1 }
 0x489   :  { %586 = vmatpush.msrb.mxu3 %v559_v2 }
 0x48b   :  { %587 = vmatpush.msrb.mxu3 %v558_v3 }
 0x48c   :  { %632 = vmatmul.msk.f32.vlgmr.msrb.gmra.mxu3 %vm568_vm1, %v562_v4 }
 0x50f   :  { %v589_v7 = vpop.f32.mrf.mxu3 }
 0x510   :  { %v590_v8 = vadd.f32 %v589_v7, %v566_v6 }
 0x512   :  { %v592_v9 = vadd.f32 %v590_v8, %v488_v5 }
 0x514   :  { %v593_v11 = vadd.f32 %v592_v9, %v769_v20 }
 0x516   :  { %594 = vst [vmem:[#allocation2] sm:$0xff] %v593_v11 }
 0x517   :  { %605 = dma.vmem_to_hbm [thread:$0]  %s601_s23, 128, %s603_s24, [#allocation3]  }
 0x518   :  { %679 = dma.done.wait [#allocation3], 128  }
 0x519   :  { %680 = vsyncadd [#allocation3], 4294967168 }
 0x51a   :  { %610 = vsyncpa [#allocation3], 1 }

</bundles_post_ra>
